<compile_context>
chip_gen: v5e
topology: v5e:2x2
jax: 0.10.0
libtpu: 0.0.40
codegen_flags: <defaults>
</compile_context>

<pallas_src>
import functools
import math

import jax
import jax.numpy as jnp
from jax.experimental import pallas as pl
from jax.experimental.pallas import tpu as pltpu


# ----------------------------- Pallas kernel ---------------------------------
def _conv1x1_ncl_kernel(x_ref, w_ref, o_ref, *, relu: bool, nb: int, precision):
    # x_ref: (NB, C_in, TL)   w_ref: (C_out, C_in)   o_ref: (NB, C_out, TL)
    w = w_ref[...]
    for b in range(nb):  # short static unroll; each iteration is one MXU matmul
        acc = jnp.dot(w, x_ref[b], preferred_element_type=jnp.float32,
                      precision=precision)
        if relu:
            acc = jnp.maximum(acc, 0.0)
        o_ref[b] = acc.astype(o_ref.dtype)


# ----------------------------- tiling heuristics ------------------------------
_VMEM_TILE_BUDGET = 12 * 1024 * 1024   # double-buffered x+out tiles + weight; safe on all gens
_MAX_TILE_L = 1024                     # roofline plateau already reached at 512-1024 wide tiles
_MAX_NB = 8


def _round_up(x, m):
    return ((x + m - 1) // m) * m


def _choose_tiles(N, L, C_in, C_out, dtype_bytes):
    """Pick (NB, tile_l): lane-dense L tile + batches-per-step under a VMEM budget."""
    # L tile: multiple of 128 (lane-dense, unmasked stores), rounded UP so L=400
    # becomes a single 512-wide tile instead of 384 + a nearly-empty edge tile.
    if L <= 128:
        # Block equals the full dim (legal).  TODO(synk): for production short
        # sequences (e.g. question length ~50) consider wrapper-side padding of L
        # to 128 to get fully unmasked lane-dense stores.
        tile_l = L
    else:
        tile_l = min(_round_up(L, 128), _MAX_TILE_L)

    w_bytes = 2 * dtype_bytes * C_in * C_out  # weight block (double-buffered)

    def fits(nb, tl):
        # x + out tiles, each double-buffered by the Pallas pipeline, + weight.
        return 2 * dtype_bytes * nb * tl * (C_in + C_out) + w_bytes <= _VMEM_TILE_BUDGET

    # Very large channel counts: shrink the L tile until even NB=1 fits.
    while tile_l > 128 and not fits(1, tile_l):
        tile_l -= 128

    grid_l = pl.cdiv(L, tile_l)

    # NB: largest divisor of N (<= _MAX_NB) that fits the budget while keeping
    # >= 2 total grid steps so v7x megacore can shard the grid across both TCs.
    nb = 1
    for cand in range(min(N, _MAX_NB), 0, -1):
        if N % cand == 0 and fits(cand, tile_l) and (N // cand) * grid_l >= 2:
            nb = cand
            break
    else:
        for cand in range(min(N, _MAX_NB), 0, -1):
            if N % cand == 0 and fits(cand, tile_l):
                nb = cand
                break
    return nb, tile_l


# ------------------------------- wrapper --------------------------------------
def conv1x1_ncl_pallas(x, w2d, *, relu: bool, nb: int = None, tile_l: int = None,
                       compute_dtype=None, precision=jax.lax.Precision.HIGHEST):
    """Pointwise conv in NCL layout.  x: (N, C_in, L), w2d: (C_out, C_in) -> (N, C_out, L)."""
    N, C_in, L = x.shape
    C_out = w2d.shape[0]
    out_dtype = x.dtype
    out_itemsize = x.dtype.itemsize

    if compute_dtype is not None and x.dtype != compute_dtype:
        # bf16 data path: halves HBM traffic; accumulation stays f32 in-kernel.
        x = x.astype(compute_dtype)
        w2d = w2d.astype(compute_dtype)

    auto_nb, auto_tl = _choose_tiles(N, L, C_in, C_out, x.dtype.itemsize)
    if nb is None:
        nb = auto_nb
    if tile_l is None:
        tile_l = auto_tl

    grid = (pl.cdiv(N, nb), pl.cdiv(L, tile_l))
    kernel = functools.partial(_conv1x1_ncl_kernel, relu=relu, nb=nb, precision=precision)
    cost = pl.CostEstimate(
        flops=2 * N * L * C_in * C_out,
        transcendentals=0,
        bytes_accessed=(x.dtype.itemsize * (N * C_in * L + C_in * C_out)
                        + out_itemsize * N * C_out * L),
    )
    return pl.pallas_call(
        kernel,
        out_shape=jax.ShapeDtypeStruct((N, C_out, L), out_dtype),
        grid_spec=pltpu.PrefetchScalarGridSpec(
            num_scalar_prefetch=0,
            grid=grid,
            in_specs=[
                pl.BlockSpec((nb, C_in, tile_l), lambda n, j: (n, 0, j)),
                pl.BlockSpec((C_out, C_in), lambda n, j: (0, 0)),
            ],
            out_specs=pl.BlockSpec((nb, C_out, tile_l), lambda n, j: (n, 0, j)),
        ),
        compiler_params=pltpu.CompilerParams(
            dimension_semantics=("parallel", "parallel"),
            vmem_limit_bytes=32 * 1024 * 1024,
        ),
        cost_estimate=cost,
    )(x, w2d)


# --------------------------- Module equivalent --------------------------------
class InitializedConv1dPallas:
    """JAX/Pallas port of Initialized_Conv1d (kernel_size=1, groups=1, bias=False).

    Weight shape follows PyTorch Conv1d: (out_channels, in_channels, kernel_size);
    a pre-squeezed (out_channels, in_channels) copy is kept for the kernel.
    """

    def __init__(self, in_channels, out_channels, kernel_size=1, relu=False,
                 stride=1, padding=0, groups=1, bias=False, *, key,
                 compute_dtype=None):
        assert kernel_size == 1 and stride == 1 and padding == 0 and groups == 1 and not bias, \
            "only the pointwise configuration (QANet default) is implemented"
        # TODO(synk): general kernel_size / stride / padding / groups / bias not
        # implemented (QANet uses the pointwise ks=1 configuration here).
        self.relu = bool(relu)
        self.compute_dtype = compute_dtype
        fan_in = in_channels * kernel_size
        fan_out = out_channels * kernel_size
        if self.relu:
            # kaiming_normal_(nonlinearity='relu'): std = sqrt(2 / fan_in)
            std = math.sqrt(2.0 / fan_in)
            w = std * jax.random.normal(key, (out_channels, in_channels, kernel_size),
                                        dtype=jnp.float32)
        else:
            # xavier_uniform_: bound = sqrt(6 / (fan_in + fan_out))
            bound = math.sqrt(6.0 / (fan_in + fan_out))
            w = jax.random.uniform(key, (out_channels, in_channels, kernel_size),
                                   minval=-bound, maxval=bound, dtype=jnp.float32)
        self.weight = w                      # (C_out, C_in, 1), PyTorch layout
        self.weight_2d = w[:, :, 0]          # (C_out, C_in), kernel layout (no per-call transpose)

    def __call__(self, x):
        # x: (N, C_in, L) -> (N, C_out, L); kernel runs NCL-native, no layout glue.
        return conv1x1_ncl_pallas(x, self.weight_2d, relu=self.relu,
                                  compute_dtype=self.compute_dtype)


# ------------------------------ reference -------------------------------------
def _ref_forward(x, weight, relu):
    # Pure-JAX reference for the same pointwise conv (f32, highest precision).
    y = jnp.einsum("ncl,oc->nol", x, weight[:, :, 0],
                   precision=jax.lax.Precision.HIGHEST)
    return jnp.maximum(y, 0.0) if relu else y


if __name__ == "__main__":
    key = jax.random.PRNGKey(0)
    k_x, k_w1, k_w2, k_x2, k_w3, k_x3, k_w4 = jax.random.split(key, 7)

    # 1) Small shapes, relu=False (xavier_uniform init): N=2, C_in=32, L=16, C_out=64.
    N, C_in, L, C_out = 2, 32, 16, 64
    x = jax.random.normal(k_x, (N, C_in, L), dtype=jnp.float32)
    mod = InitializedConv1dPallas(C_in, C_out, kernel_size=1, relu=False, key=k_w1)
    y = jax.block_until_ready(mod(x))
    y_ref = _ref_forward(x, mod.weight, relu=False)
    assert y.shape == (N, C_out, L)
    assert jnp.allclose(y, y_ref, atol=1e-5, rtol=1e-5)

    # 2) relu=True (kaiming_normal init + fused in-kernel ReLU), same shapes.
    mod_r = InitializedConv1dPallas(C_in, C_out, kernel_size=1, relu=True, key=k_w2)
    y_r = jax.block_until_ready(mod_r(x))
    y_r_ref = _ref_forward(x, mod_r.weight, relu=True)
    assert jnp.allclose(y_r, y_r_ref, atol=1e-5, rtol=1e-5)
    assert jnp.min(y_r) >= 0.0

    # 3) QANet-like shape with L NOT divisible by 128 (L=400): exercises the
    #    rounded-up 512-wide tile (masked edge writeback) and NB=2 batch blocking.
    N2, C2_in, L2, C2_out = 4, 128, 400, 128
    x2 = jax.random.normal(k_x2, (N2, C2_in, L2), dtype=jnp.float32)
    mod2 = InitializedConv1dPallas(C2_in, C2_out, kernel_size=1, relu=True, key=k_w3)
    y2 = jax.block_until_ready(mod2(x2))
    y2_ref = _ref_forward(x2, mod2.weight, relu=True)
    assert y2.shape == (N2, C2_out, L2)
    assert jnp.allclose(y2, y2_ref, atol=1e-4, rtol=1e-4)

    # 4) Optional bf16 data path (half the HBM bytes), loose tolerance vs f32 ref.
    N3, C3_in, L3, C3_out = 2, 32, 256, 64
    x3 = jax.random.normal(k_x3, (N3, C3_in, L3), dtype=jnp.float32)
    mod3 = InitializedConv1dPallas(C3_in, C3_out, kernel_size=1, relu=True, key=k_w4,
                                   compute_dtype=jnp.bfloat16)
    y3 = jax.block_until_ready(mod3(x3))
    y3_ref = _ref_forward(x3, mod3.weight, relu=True)
    assert y3.shape == (N3, C3_out, L3)
    assert y3.dtype == x3.dtype
    assert jnp.allclose(y3, y3_ref, atol=5e-2, rtol=5e-2)

    print("KERNEL_OK")
</pallas_src>

<mosaic_0001>
module attributes {stable_mosaic.version = 11 : i64} {
  func.func @_conv1x1_ncl_kernel(%arg0: i32, %arg1: i32, %arg2: memref<1x32x16xf32, #tpu.memory_space<vmem>>, %arg3: memref<64x32xf32, #tpu.memory_space<vmem>>, %arg4: memref<1x64x16xf32, #tpu.memory_space<vmem>>) attributes {dimension_semantics = [#tpu.dimension_semantics<parallel>, #tpu.dimension_semantics<parallel>], iteration_bounds = array<i64: 2, 1>, scalar_prefetch = 0 : i64, scratch_operands = 0 : i64, tpu.core_type = #tpu.core_type<tc>, window_params = [{transform_indices = @transform_0, window_bounds = array<i64: 1, 32, 16>}, {pipeline_mode = #tpu.pipeline_mode<synchronous>, transform_indices = @transform_1, window_bounds = array<i64: 64, 32>}, {transform_indices = @transform_2, window_bounds = array<i64: 1, 64, 16>}]} {
    %c0 = arith.constant 0 : index
    %c0_0 = arith.constant 0 : index
    %0 = vector.load %arg3[%c0, %c0_0] : memref<64x32xf32, #tpu.memory_space<vmem>>, vector<64x32xf32>
    %c0_1 = arith.constant 0 : index
    %c0_2 = arith.constant 0 : index
    %c0_3 = arith.constant 0 : index
    %1 = vector.load %arg2[%c0_1, %c0_2, %c0_3] : memref<1x32x16xf32, #tpu.memory_space<vmem>>, vector<1x32x16xf32>
    %2 = vector.shape_cast %1 : vector<1x32x16xf32> to vector<32x16xf32>
    %cst = arith.constant dense<0.000000e+00> : vector<64x16xf32>
    %3 = tpu.matmul %0, %2, %cst {dimension_numbers = #tpu.dot_dimension_numbers<[1], [0], [0], [1], [0, 0, 1, 1], [], []>, precision = #tpu.contract_precision<fp32>} : vector<64x32xf32>, vector<32x16xf32>, vector<64x16xf32> -> vector<64x16xf32>
    %c0_4 = arith.constant 0 : index
    %c0_5 = arith.constant 0 : index
    %c0_6 = arith.constant 0 : index
    %4 = vector.load %arg4[%c0_4, %c0_5, %c0_6] : memref<1x64x16xf32, #tpu.memory_space<vmem>>, vector<1x64x16xf32>
    %5 = vector.shape_cast %4 : vector<1x64x16xf32> to vector<64x16xf32>
    %6 = vector.shape_cast %3 : vector<64x16xf32> to vector<1x64x16xf32>
    tpu.vector_store %arg4[%c0_4, %c0_5, %c0_6], %6 {strides = array<i32>} : memref<1x64x16xf32, #tpu.memory_space<vmem>>, vector<1x64x16xf32>,
    return
  }
  func.func @transform_0(%arg0: i32, %arg1: i32) -> (i32, i32, i32) {
    %c0_i32 = arith.constant 0 : i32
    %c0_i32_0 = arith.constant 0 : i32
    return %arg0, %c0_i32, %arg1 : i32, i32, i32
  }
  func.func @transform_1(%arg0: i32, %arg1: i32) -> (i32, i32) {
    %c0_i32 = arith.constant 0 : i32
    %c0_i32_0 = arith.constant 0 : i32
    %c0_i32_1 = arith.constant 0 : i32
    return %c0_i32, %c0_i32_0 : i32, i32
  }
  func.func @transform_2(%arg0: i32, %arg1: i32) -> (i32, i32, i32) {
    %c0_i32 = arith.constant 0 : i32
    %c0_i32_0 = arith.constant 0 : i32
    return %arg0, %c0_i32, %arg1 : i32, i32, i32
  }
}

</mosaic_0001>

<bundles_post_ra>
// kernel: tpu_custom_call.1
= control target key start
LH: loop header
LB: loop body
LE: loop exit
PB: predicated region body
PF: predicated region fallthrough
CT: control target
= control target key end

     0   :  { %s790_s9 = smov 0   ;;  %s792_s10 = smov 0   ;;  %s1022_s0 = inlined_call_operand.vmem [shape: f32[2,32,16], index: 0, kind: input, shape index: {}]   ;;  %s1023_s1 = inlined_call_operand.vmem [shape: f32[64,32], index: 1, kind: input, shape index: {}]   ;;  %s1024_s2 = inlined_call_operand.vmem [shape: f32[2,64,16], index: 2, kind: output, shape index: {}]  }
   0x1   :  { %s794_s11 = smov 0  }
   0x2 LB: > { %s24_s12 = sadd.s32 1, %s769_s10  ;;  %p710_p0 = scmp.ge.s32.totalorder %s773_s11, 1  ;;  %s773_s11 = sphi %s794_s11, %s12_s11   ;;  %s769_s10 = sphi %s792_s10, %s1026_s10   ;;  %s765_s9 = sphi %s790_s9, %s1025_s9  }
   0x3   : > { %p26_p1 = scmp.ge.s32.totalorder %s24_s12, 2  ;;  %p131_p2 = scmp.lt.s32.totalorder %s773_s11, 3 }
   0x5   : > { %s1028_s12 = smov (%p26_p1, %s24_s12), 0  ;;  %p132_p3 = pnand %p710_p0, %p131_p2 }
   0x6   : > { %p159_p4 = scmp.lt.s32.totalorder (!%p132_p3), %s765_s9, 1 }
   0x7   : > { %135 = sbr.rel (%p132_p3) target bundleno = 260 (0x104), region = 28 }
   0xc   : > { %v179_v0 = vld [vmem:[%s1023_s1 + $0x20] sm:$0xff]  ;;  %vm187_vm0 = vcmask 261120   ;;  %v180_v1 = vld [vmem:[%s1023_s1 + $0x28] sm:$0xff]  ;;  %s1030_s9 = smov (!%p159_p4, %s765_s9), 1  ;;  %v181_v13 = vld [vmem:[%s1023_s1 + $0x30] sm:$0xff]  ;;  %vm614_vm1 = vcmask 130048  }
   0xd   : > { %v175_v2 = vld [vmem:[%s1023_s1] sm:$0xff]  ;;  %v201_v3 = vsel %vm187_vm0, %v179_v0, 0  ;;  %v204_v4 = vsel %vm187_vm0, %v180_v1, 0  ;;  %v176_v6 = vld [vmem:[%s1023_s1 + $0x8] sm:$0xff]  ;;  %s717_s21 = sshll.u32 %s1030_s9, 5  ;;  %v207_v24 = vsel %vm187_vm0, %v181_v13, 0 }
   0xe   : > { %v189_v5 = vsel %vm187_vm0, %v175_v2, 0  ;;  %v825_v7 = vand.u32 4294901760, %v201_v3  ;;  %v192_v9 = vsel %vm187_vm0, %v176_v6, 0  ;;  %v834_v11 = vand.u32 4294901760, %v204_v4  ;;  %s166_s26 = scalar_lea.vmem %s1022_s0, %s717_s21  ;;  %v177_v29 = vld [vmem:[%s1023_s1 + $0x10] sm:$0xff]  ;;  %v182_v48 = vld [vmem:[%s1023_s1 + $0x38] sm:$0xff] }
   0xf   : > { %v827_v8 = vand.u32 4294901760, %v189_v5  ;;  %v186_v14 = vld [vmem:[%s166_s26 + $0x18] sm:$0xff]  ;;  %v185_v15 = vld [vmem:[%s166_s26 + $0x10] sm:$0xff]  ;;  %v184_v16 = vld [vmem:[%s166_s26 + $0x8] sm:$0xff]  ;;  %v847_v19 = vand.u32 4294901760, %v192_v9  ;;  %v878_v34 = vand.u32 4294901760, %v207_v24 }
  0x10   : > { %v832_v10 = vsub.f32 %v201_v3, %v825_v7  ;;  %v849_v20 = vand.u32 4294901760, %v186_v14  ;;  %v851_v21 = vand.u32 4294901760, %v185_v15  ;;  %v853_v22 = vand.u32 4294901760, %v184_v16  ;;  %v183_v23 = vld [vmem:[%s166_s26] sm:$0xff]  ;;  %v178_v55 = vld [vmem:[%s1023_s1 + $0x18] sm:$0xff]  ;;  %s718_s5 = sshll.u32 %s1030_s9, 6 }
  0x11   : > { %v837_v12 = vsub.f32 %v189_v5, %v827_v8  ;;  %v856_v25 = vand.u32 4294901760, %v183_v23  ;;  %v862_v27 = vsub.f32 %v204_v4, %v834_v11  ;;  %v881_v35 = vsub.f32 %v192_v9, %v847_v19  ;;  %s990_s8 = scalar_lea.vmem %s1024_s2, %s718_s5 }
  0x12   : > { %v266_v17 = vand.u32 4294901760, %v832_v10  ;;  %719 = vmatpush.msra.mxu2 %v849_v20  ;;  %v310_v30 = vsub.f32 %v186_v14, %v849_v20  ;;  %v316_v31 = vsub.f32 %v185_v15, %v851_v21  ;;  %v322_v32 = vsub.f32 %v184_v16, %v853_v22  ;;  %225 = vmatpush.msra.mxu0 %v849_v20 }
  0x13   : > { %v234_v18 = vand.u32 4294901760, %v837_v12  ;;  %v876_v33 = vsub.f32 %v183_v23, %v856_v25  ;;  %v195_v39 = vsel %vm187_vm0, %v177_v29, 0  ;;  %v274_v42 = vand.u32 4294901760, %v862_v27 }
  0x14   : > { %v267_v26 = vsub.f32 %v832_v10, %v266_v17  ;;  %720 = vmatpush.msra.mxu2 %v851_v21  ;;  %v311_v36 = vand.u32 4294901760, %v310_v30  ;;  %v317_v37 = vand.u32 4294901760, %v316_v31  ;;  %v323_v38 = vand.u32 4294901760, %v322_v32  ;;  %227 = vmatpush.msra.mxu0 %v851_v21 }
  0x15   : > { %v235_v28 = vsub.f32 %v837_v12, %v234_v18  ;;  %v329_v41 = vand.u32 4294901760, %v876_v33  ;;  %v242_v47 = vand.u32 4294901760, %v881_v35  ;;  %v894_v49 = vand.u32 4294901760, %v195_v39 }
  0x16   : > { %v268_v40 = vand.u32 4294901760, %v267_v26  ;;  %721 = vmatpush.msra.mxu2 %v853_v22  ;;  %v312_v44 = vsub.f32 %v310_v30, %v311_v36  ;;  %v318_v45 = vsub.f32 %v316_v31, %v317_v37  ;;  %v324_v46 = vsub.f32 %v322_v32, %v323_v38  ;;  %229 = vmatpush.msra.mxu0 %v853_v22 }
  0x17   : > { %v236_v43 = vand.u32 4294901760, %v235_v28  ;;  %v330_v52 = vsub.f32 %v876_v33, %v329_v41  ;;  %v275_v53 = vsub.f32 %v862_v27, %v274_v42  ;;  %v903_v54 = vsub.f32 %v207_v24, %v878_v34 }
  0x18   : > { %722 = vmatpush.msra.mxu2 %v856_v25  ;;  %v313_v50 = vand.u32 4294901760, %v312_v44  ;;  %v319_v51 = vand.u32 4294901760, %v318_v45  ;;  %231 = vmatpush.msra.mxu0 %v856_v25  ;;  %v325_v56 = vand.u32 4294901760, %v324_v46  ;;  %v210_v57 = vsel %vm187_vm0, %v182_v48, 0 }
  0x19   : > { %269 = vmatmul.f32.vlgmr.msra.gmra.mxu2 %v268_v40  ;;  %237 = vmatmul.f32.vlgmr.msra.gmra.mxu0 %v236_v43  ;;  %v243_v58 = vsub.f32 %v881_v35, %v242_v47  ;;  %v913_v59 = vsub.f32 %v195_v39, %v894_v49  ;;  %v331_v60 = vand.u32 4294901760, %v330_v52  ;;  %v198_v61 = vsel %vm187_vm0, %v178_v55, 0 }
  0x1a   : > { %723 = vmatpush.msra.mxu3 %v313_v50  ;;  %380 = vmatpush.msrb.mxu2 %v310_v30  ;;  %v276_v62 = vand.u32 4294901760, %v275_v53  ;;  %v282_v63 = vand.u32 4294901760, %v903_v54  ;;  %v917_v0 = vand.u32 4294901760, %v210_v57  ;;  %v256_v3 = vand.u32 4294901760, %v198_v61 }
  0x1b   : > { %314 = vmatpush.msra.mxu1 %v313_v50  ;;  %515 = vmatpush.msrb.mxu0 %v311_v36  ;;  %v244_v1 = vand.u32 4294901760, %v243_v58  ;;  %v250_v2 = vand.u32 4294901760, %v913_v59 }
  0x1c   : > { %724 = vmatpush.msra.mxu3 %v319_v51  ;;  %383 = vmatpush.msrb.mxu2 %v316_v31  ;;  %v283_v4 = vsub.f32 %v903_v54, %v282_v63  ;;  %v926_v5 = vsub.f32 %v210_v57, %v917_v0  ;;  %v257_v9 = vsub.f32 %v198_v61, %v256_v3 }
  0x1d   : > { %320 = vmatpush.msra.mxu1 %v319_v51  ;;  %519 = vmatpush.msrb.mxu0 %v317_v37  ;;  %v251_v6 = vsub.f32 %v913_v59, %v250_v2 }
  0x1e   : > { %725 = vmatpush.msra.mxu3 %v325_v56  ;;  %386 = vmatpush.msrb.mxu2 %v322_v32  ;;  %v284_v13 = vand.u32 4294901760, %v283_v4  ;;  %v290_v14 = vand.u32 4294901760, %v926_v5  ;;  %v258_v16 = vand.u32 4294901760, %v257_v9 }
  0x1f   : > { %326 = vmatpush.msra.mxu1 %v325_v56  ;;  %523 = vmatpush.msrb.mxu0 %v323_v38  ;;  %v252_v15 = vand.u32 4294901760, %v251_v6 }
  0x20   : > { %726 = vmatpush.msra.mxu3 %v331_v60  ;;  %389 = vmatpush.msrb.mxu2 %v876_v33  ;;  %v291_v23 = vsub.f32 %v926_v5, %v290_v14 }
  0x21   : > { %277 = vmatmul.f32.gmra.mxu2 %v276_v62  ;;  %350 = vmatmul.f32.vlgmr.msra.gmra.mxu3 %v825_v7 }
  0x22   : > { %444 = vmatpush.msrb.mxu3 %v849_v20  ;;  %332 = vmatpush.msra.mxu1 %v331_v60  ;;  %v292_v24 = vand.u32 4294901760, %v291_v23 }
  0x23   : > { %334 = vmatmul.f32.vlgmr.msra.gmra.mxu1 %v827_v8  ;;  %245 = vmatmul.f32.gmra.mxu0 %v244_v1 }
  0x24   : > { %446 = vmatpush.msrb.mxu3 %v851_v21  ;;  %574 = vmatpush.msrb.mxu1 %v849_v20  ;;  %v259_v20 = vsub.f32 %v257_v9, %v258_v16 }
  0x25   : > { %527 = vmatpush.msrb.mxu0 %v329_v41 }
  0x26   : > { %448 = vmatpush.msrb.mxu3 %v853_v22  ;;  %576 = vmatpush.msrb.mxu1 %v851_v21  ;;  %v260_v26 = vand.u32 4294901760, %v259_v20 }
  0x28   : > { %450 = vmatpush.msrb.mxu3 %v856_v25  ;;  %578 = vmatpush.msrb.mxu1 %v853_v22 }
  0x29   : > { %285 = vmatmul.f32.gmra.mxu2 %v284_v13  ;;  %354 = vmatmul.f32.gmra.mxu3 %v834_v11 }
  0x2a   : > { %580 = vmatpush.msrb.mxu1 %v856_v25 }
  0x2b   : > { %338 = vmatmul.f32.gmra.mxu1 %v847_v19  ;;  %253 = vmatmul.f32.gmra.mxu0 %v252_v15 }
  0x31   : > { %293 = vmatmul.f32.gmra.mxu2 %v292_v24  ;;  %358 = vmatmul.f32.gmra.mxu3 %v878_v34 }
  0x33   : > { %342 = vmatmul.f32.gmra.mxu1 %v894_v49  ;;  %261 = vmatmul.f32.gmra.mxu0 %v260_v26 }
  0x39   : > { %362 = vmatmul.f32.gmra.mxu3 %v917_v0  ;;  %392 = vmatmul.f32.vlgmr.msrb.gmra.mxu2 %v837_v12 }
  0x3b   : > { %346 = vmatmul.f32.gmra.mxu1 %v256_v3  ;;  %529 = vmatmul.f32.vlgmr.msrb.gmra.mxu0 %v827_v8 }
  0x41   : > { %397 = vmatmul.f32.gmra.mxu2 %v881_v35  ;;  %454 = vmatmul.f32.vlgmr.msrb.gmra.mxu3 %v234_v18 }
  0x43   : > { %582 = vmatmul.f32.vlgmr.msrb.gmra.mxu1 %v827_v8  ;;  %533 = vmatmul.f32.gmra.mxu0 %v847_v19 }
  0x49   : > { %402 = vmatmul.f32.gmra.mxu2 %v913_v59  ;;  %460 = vmatmul.f32.gmra.mxu3 %v242_v47 }
  0x4b   : > { %586 = vmatmul.f32.gmra.mxu1 %v847_v19  ;;  %537 = vmatmul.f32.gmra.mxu0 %v894_v49 }
  0x51   : > { %407 = vmatmul.f32.gmra.mxu2 %v257_v9  ;;  %466 = vmatmul.f32.gmra.mxu3 %v250_v2 }
  0x53   : > { %590 = vmatmul.f32.gmra.mxu1 %v894_v49  ;;  %541 = vmatmul.f32.gmra.mxu0 %v256_v3 }
  0x59   : > { %412 = vmatmul.f32.gmra.mxu2 %v832_v10  ;;  %472 = vmatmul.f32.gmra.mxu3 %v258_v16 }
  0x5b   : > { %594 = vmatmul.f32.gmra.mxu1 %v256_v3  ;;  %545 = vmatmul.f32.gmra.mxu0 %v825_v7 }
  0x61   : > { %417 = vmatmul.f32.gmra.mxu2 %v862_v27  ;;  %478 = vmatmul.f32.gmra.mxu3 %v266_v17 }
  0x63   : > { %598 = vmatmul.f32.gmra.mxu1 %v825_v7  ;;  %549 = vmatmul.f32.gmra.mxu0 %v834_v11 }
  0x69   : > { %422 = vmatmul.f32.gmra.mxu2 %v903_v54  ;;  %484 = vmatmul.f32.gmra.mxu3 %v274_v42 }
  0x6b   : > { %602 = vmatmul.f32.gmra.mxu1 %v834_v11  ;;  %553 = vmatmul.f32.gmra.mxu0 %v878_v34 }
  0x71   : > { %427 = vmatmul.f32.gmra.mxu2 %v926_v5  ;;  %490 = vmatmul.f32.gmra.mxu3 %v282_v63 }
  0x73   : > { %606 = vmatmul.f32.gmra.mxu1 %v878_v34  ;;  %557 = vmatmul.f32.gmra.mxu0 %v917_v0 }
  0x79   : > { %496 = vmatmul.f32.gmra.mxu3 %v290_v14 }
  0x7b   : > { %610 = vmatmul.f32.gmra.mxu1 %v917_v0 }
  0x96   : > { %v238_v7 = vpop.f32.mrf.mxu0 }
  0x9c   : > { %v270_v8 = vpop.f32.mrf.mxu2 }
  0xa0   : > { %v335_v10 = vpop.f32.mrf.mxu1  ;;  %v246_v12 = vpop.f32.mrf.mxu0 }
  0xa1   : > { %v336_v36 = vadd.f32 %v335_v10, %v238_v7 }
  0xa4   : > { %v976_v17 = vpop.f32.mrf.mxu2  ;;  %v351_v11 = vpop.f32.mrf.mxu3 }
  0xa5   : > { %v352_v6 = vadd.f32 %v351_v11, %v270_v8 }
  0xa8   : > { %v339_v18 = vpop.f32.mrf.mxu1  ;;  %v254_v19 = vpop.f32.mrf.mxu0 }
  0xa9   : > { %v340_v43 = vadd.f32 %v339_v18, %v246_v12 }
  0xac   : > { %v978_v21 = vpop.f32.mrf.mxu2  ;;  %v355_v22 = vpop.f32.mrf.mxu3 }
  0xad   : > { %v356_v24 = vadd.f32 %v355_v22, %v976_v17 }
  0xb0   : > { %v343_v25 = vpop.f32.mrf.mxu1  ;;  %v262_v27 = vpop.f32.mrf.mxu0 }
  0xb1   : > { %v344_v52 = vadd.f32 %v343_v25, %v254_v19 }
  0xb4   : > { %v980_v28 = vpop.f32.mrf.mxu2  ;;  %v982_v29 = vpop.f32.mrf.mxu3 }
  0xb5   : > { %v360_v19 = vadd.f32 %v982_v29, %v978_v21 }
  0xb8   : > { %v347_v30 = vpop.f32.mrf.mxu1  ;;  %v530_v31 = vpop.f32.mrf.mxu0 }
  0xb9   : > { %v348_v61 = vadd.f32 %v347_v30, %v262_v27 }
  0xbc   : > { %v984_v32 = vpop.f32.mrf.mxu3  ;;  %v393_v33 = vpop.f32.mrf.mxu2 }
  0xbd   : > { %v394_v37 = vadd.f32 %v393_v33, %v336_v36 }
  0xc0   : > { %v583_v34 = vpop.f32.mrf.mxu1  ;;  %v534_v35 = vpop.f32.mrf.mxu0 }
  0xc4   : > { %v398_v38 = vpop.f32.mrf.mxu2  ;;  %v455_v39 = vpop.f32.mrf.mxu3 }
  0xc5   : > { %v456_v40 = vadd.f32 %v455_v39, %v394_v37  ;;  %v399_v46 = vadd.f32 %v398_v38, %v340_v43 }
  0xc7   : > { %v531_v41 = vadd.f32 %v530_v31, %v456_v40 }
  0xc8   : > { %v587_v42 = vpop.f32.mrf.mxu1  ;;  %v538_v45 = vpop.f32.mrf.mxu0 }
  0xc9   : > { %v584_v44 = vadd.f32 %v583_v34, %v531_v41 }
  0xcb   : > { %615 = vst.msk [vmem:[%s990_s8] sm:$0xff] %vm614_vm1, %v584_v44 }
  0xcc   : > { %v403_v47 = vpop.f32.mrf.mxu2  ;;  %v461_v48 = vpop.f32.mrf.mxu3 }
  0xcd   : > { %v462_v49 = vadd.f32 %v461_v48, %v399_v46  ;;  %v404_v54 = vadd.f32 %v403_v47, %v344_v52 }
  0xcf   : > { %v535_v50 = vadd.f32 %v534_v35, %v462_v49  ;;  %v364_v35 = vadd.f32 %v984_v32, %v980_v28 }
  0xd0   : > { %v591_v51 = vpop.f32.mrf.mxu1  ;;  %v542_v55 = vpop.f32.mrf.mxu0 }
  0xd1   : > { %v588_v53 = vadd.f32 %v587_v42, %v535_v50 }
  0xd3   : > { %616 = vst.msk [vmem:[%s990_s8 + $0x8] sm:$0xff] %vm614_vm1, %v588_v53 }
  0xd4   : > { %v408_v56 = vpop.f32.mrf.mxu2  ;;  %v467_v57 = vpop.f32.mrf.mxu3 }
  0xd5   : > { %v468_v58 = vadd.f32 %v467_v57, %v404_v54  ;;  %v409_v63 = vadd.f32 %v408_v56, %v348_v61 }
  0xd7   : > { %v539_v59 = vadd.f32 %v538_v45, %v468_v58 }
  0xd8   : > { %v595_v60 = vpop.f32.mrf.mxu1  ;;  %v546_v3 = vpop.f32.mrf.mxu0 }
  0xd9   : > { %v592_v62 = vadd.f32 %v591_v51, %v539_v59 }
  0xdb   : > { %617 = vst.msk [vmem:[%s990_s8 + $0x10] sm:$0xff] %vm614_vm1, %v592_v62 }
  0xdc   : > { %v413_v0 = vpop.f32.mrf.mxu2  ;;  %v473_v1 = vpop.f32.mrf.mxu3 }
  0xdd   : > { %v474_v2 = vadd.f32 %v473_v1, %v409_v63  ;;  %v414_v13 = vadd.f32 %v413_v0, %v352_v6 }
  0xdf   : > { %v543_v4 = vadd.f32 %v542_v55, %v474_v2 }
  0xe0   : > { %v599_v5 = vpop.f32.mrf.mxu1  ;;  %v550_v20 = vpop.f32.mrf.mxu0 }
  0xe1   : > { %v596_v9 = vadd.f32 %v595_v60, %v543_v4 }
  0xe3   : > { %618 = vst.msk [vmem:[%s990_s8 + $0x18] sm:$0xff] %vm614_vm1, %v596_v9 }
  0xe4   : > { %v418_v14 = vpop.f32.mrf.mxu2  ;;  %v479_v15 = vpop.f32.mrf.mxu3 }
  0xe5   : > { %v480_v16 = vadd.f32 %v479_v15, %v414_v13  ;;  %v419_v10 = vadd.f32 %v418_v14, %v356_v24 }
  0xe7   : > { %v547_v23 = vadd.f32 %v546_v3, %v480_v16 }
  0xe8   : > { %v603_v7 = vpop.f32.mrf.mxu1  ;;  %v554_v27 = vpop.f32.mrf.mxu0 }
  0xe9   : > { %v600_v26 = vadd.f32 %v599_v5, %v547_v23 }
  0xeb   : > { %619 = vst.msk [vmem:[%s990_s8 + $0x20] sm:$0xff] %vm614_vm1, %v600_v26 }
  0xec   : > { %v485_v12 = vpop.f32.mrf.mxu3  ;;  %v423_v8 = vpop.f32.mrf.mxu2 }
  0xed   : > { %v486_v18 = vadd.f32 %v485_v12, %v419_v10  ;;  %v424_v30 = vadd.f32 %v423_v8, %v360_v19 }
  0xef   : > { %v551_v11 = vadd.f32 %v550_v20, %v486_v18 }
  0xf0   : > { %v607_v22 = vpop.f32.mrf.mxu1  ;;  %v558_v21 = vpop.f32.mrf.mxu0 }
  0xf1   : > { %v604_v25 = vadd.f32 %v603_v7, %v551_v11 }
  0xf3   : > { %620 = vst.msk [vmem:[%s990_s8 + $0x28] sm:$0xff] %vm614_vm1, %v604_v25 }
  0xf4   : > { %v491_v17 = vpop.f32.mrf.mxu3  ;;  %v428_v34 = vpop.f32.mrf.mxu2 }
  0xf5   : > { %v492_v31 = vadd.f32 %v491_v17, %v424_v30  ;;  %v429_v37 = vadd.f32 %v428_v34, %v364_v35 }
  0xf7   : > { %v555_v33 = vadd.f32 %v554_v27, %v492_v31 }
  0xf8   : > { %v611_v39 = vpop.f32.mrf.mxu1 }
  0xf9   : > { %v608_v36 = vadd.f32 %v607_v22, %v555_v33 }
  0xfb   : > { %621 = vst.msk [vmem:[%s990_s8 + $0x30] sm:$0xff] %vm614_vm1, %v608_v36 }
  0xfc   : > { %v497_v38 = vpop.f32.mrf.mxu3 }
  0xfd   : > { %v498_v29 = vadd.f32 %v497_v38, %v429_v37 }
  0xff   : > { %v559_v40 = vadd.f32 %v558_v21, %v498_v29 }
 0x101   : > { %v612_v41 = vadd.f32 %v611_v39, %v559_v40 }
 0x103   : > { %622 = vst.msk [vmem:[%s990_s8 + $0x38] sm:$0xff] %vm614_vm1, %v612_v41 }
 0x104 PF: > { %s12_s11 = sadd.s32 1, %s773_s11   ;;  %s1025_s9 = smov %s769_s10 }
 0x105   : > { %p9_p5 = scmp.ge.s32.totalorder %s12_s11, 4   ;;  %s1026_s10 = smov %s1028_s12 }
 0x107   :  { %11 = sbr.rel (!%p9_p5) target bundleno = 2 (0x2), region = 58 }

</bundles_post_ra>
